<compile_context>
chip_gen: v7x
topology: tpu7x:2x2x1
jax: 0.10.0
libtpu: 0.0.40
codegen_flags: <defaults>
</compile_context>

<pallas_src>
import jax
import jax.numpy as jnp
from jax.experimental import pallas as pl
from jax.experimental.pallas import tpu as pltpu

_EPS = 1e-5
_LANES = 128
_SUBLANES = 8


def _round_up(n, m):
    return ((n + m - 1) // m) * m


def _svbrdf_partial_kernel(x_ref, y_ref, out_ref):
    """One pixel tile: per-map |diff| partial sums + sum(y), kept vreg-shaped.

    x_ref, y_ref : (B, 12, TROW, 128) native dtype, VMEM (lane-dense pixels)
    out_ref      : (1, 5, 8, 128) f32 partial sums for this grid step
        [0] sum |clamp(xn,-1,1) - yn|
        [1] sum |log(clamp(xd,0,1)+eps) - log(yd+eps)|
        [2] sum |clamp(xr,0,1) - yr|
        [3] sum |log(clamp(xs,0,1)+eps) - log(ys+eps)|
        [4] sum(y)                       (used by the dis-loss branch)
    Reductions stay (8,128)-shaped (pure sublane/lane-preserving VPU adds);
    the single cross-lane collapse to scalars is done once outside the kernel.
    """
    x = x_ref[...].astype(jnp.float32)
    y = y_ref[...].astype(jnp.float32)

    def vsum(d):
        # (..., TROW, 128) -> (8, 128): vreg-aligned reshape + axis-0 adds only.
        return d.reshape(-1, _SUBLANES, _LANES).sum(axis=0)

    # --- unpack_svbrdf: channel groups of 3 along dim 1 ---
    xn = jnp.clip(x[:, 0:3], -1.0, 1.0)
    xd = jnp.log(jnp.clip(x[:, 3:6], 0.0, 1.0) + _EPS)
    xr = jnp.clip(x[:, 6:9], 0.0, 1.0)
    xs = jnp.log(jnp.clip(x[:, 9:12], 0.0, 1.0) + _EPS)

    yn = y[:, 0:3]
    yd = jnp.log(y[:, 3:6] + _EPS)
    yr = y[:, 6:9]
    ys = jnp.log(y[:, 9:12] + _EPS)

    out_ref[0, 0] = vsum(jnp.abs(xn - yn))
    out_ref[0, 1] = vsum(jnp.abs(xd - yd))
    out_ref[0, 2] = vsum(jnp.abs(xr - yr))
    out_ref[0, 3] = vsum(jnp.abs(xs - ys))
    out_ref[0, 4] = vsum(y)


def _svbrdf_stats(x, y, *, tpix=2048):
    """Returns (group_means[4], mean_y) computed by the gridded Pallas kernel."""
    assert x.shape == y.shape and x.ndim == 4 and x.shape[1] == 12, \
        "expected (B, 12, H, W)"
    B, C, H, W = x.shape
    P = H * W

    # Pixel tile: multiple of 1024 (so in-kernel reshapes stay vreg-aligned),
    # shrunk if needed so 2 operands x 2 pipeline buffers fit comfortably in
    # the scoped VMEM of every generation (16 MiB v5e, 32 MiB v6e/v7x).
    tpix = max(1024, min(int(tpix), _round_up(P, 1024)))
    itemsize = max(jnp.dtype(x.dtype).itemsize, jnp.dtype(y.dtype).itemsize)
    while tpix > 1024 and B * C * tpix * itemsize * 4 > (8 << 20):
        tpix //= 2

    pp = _round_up(P, tpix)          # padded pixel count
    trow = tpix // _LANES            # sublane-rows per tile (multiple of 8)
    nrow = pp // _LANES
    ntiles = pp // tpix

    def prep(a):
        a = a.reshape(B, C, P)
        if pp != P:
            # Zero padding contributes exactly 0 to every partial sum.
            a = jnp.pad(a, ((0, 0), (0, 0), (0, pp - P)))
        return a.reshape(B, C, nrow, _LANES)

    partials = pl.pallas_call(
        _svbrdf_partial_kernel,
        out_shape=jax.ShapeDtypeStruct((ntiles, 5, _SUBLANES, _LANES),
                                       jnp.float32),
        grid=(ntiles,),
        in_specs=[
            pl.BlockSpec((B, C, trow, _LANES), lambda t: (0, 0, t, 0)),
            pl.BlockSpec((B, C, trow, _LANES), lambda t: (0, 0, t, 0)),
        ],
        out_specs=pl.BlockSpec((1, 5, _SUBLANES, _LANES),
                               lambda t: (t, 0, 0, 0)),
        compiler_params=pltpu.CompilerParams(
            dimension_semantics=("parallel",)),   # shards tiles on v7x's 2 TCs
    )(prep(x), prep(y))

    sums = jnp.sum(partials, axis=(0, 2, 3))          # (5,) tiny final reduce
    n_group = jnp.float32(B * 3 * H * W)               # true counts (unpadded)
    n_total = jnp.float32(B * 12 * H * W)
    return sums[:4] / n_group, sums[4] / n_total


def my_loss(x, y, dis=None):
    """JAX/Pallas equivalent of MyLoss.forward(x, y, dis)."""
    group_means, mean_y = _svbrdf_stats(x, y)
    l1_loss = jnp.sum(group_means)

    # TODO(synk): RenderingLoss (env.generate_*_scenes + renderer.render) has no
    # in-script definition; contribution kept at 0.
    rendering_loss = jnp.float32(0.0)

    dis_loss = jnp.float32(0.0)
    if dis is not None:
        d = (mean_y - jnp.log(1.0 - dis[0])) + (mean_y - jnp.log(1.0 - dis[1]))
        dis_loss = jnp.mean(d)

    return 100.0 * l1_loss + 10.0 * rendering_loss + 1.0 * dis_loss


if __name__ == "__main__":
    key = jax.random.PRNGKey(0)
    kx, ky, kd0, kd1 = jax.random.split(key, 4)

    B, C, H, W = 2, 12, 16, 16
    # Predicted SVBRDF: unconstrained (exercises the clamps).
    x = jax.random.normal(kx, (B, C, H, W), dtype=jnp.float32)
    # Target SVBRDF: in [0, 1] so the target log() terms stay finite
    # (same precondition the PyTorch code relies on).
    y = jax.random.uniform(ky, (B, C, H, W), dtype=jnp.float32)

    # Discriminator outputs in (0, 1) so log(1 - dis) is finite.
    dis = (
        jax.random.uniform(kd0, (4,), dtype=jnp.float32, minval=0.05, maxval=0.95),
        jax.random.uniform(kd1, (4,), dtype=jnp.float32, minval=0.05, maxval=0.95),
    )

    loss = jax.block_until_ready(my_loss(x, y, dis))
    assert loss.shape == () and jnp.isfinite(loss)
    print("KERNEL_OK")
</pallas_src>

<mosaic_0001>
module attributes {stable_mosaic.version = 11 : i64} {
  func.func @_svbrdf_partial_kernel(%arg0: i32, %arg1: memref<2x12x8x128xf32, #tpu.memory_space<vmem>>, %arg2: memref<2x12x8x128xf32, #tpu.memory_space<vmem>>, %arg3: memref<1x5x8x128xf32, #tpu.memory_space<vmem>>) attributes {dimension_semantics = [#tpu.dimension_semantics<parallel>], iteration_bounds = array<i64: 1>, scalar_prefetch = 0 : i64, scratch_operands = 0 : i64, tpu.core_type = #tpu.core_type<tc>, window_params = [{transform_indices = @transform_0, window_bounds = array<i64: 2, 12, 8, 128>}, {transform_indices = @transform_1, window_bounds = array<i64: 2, 12, 8, 128>}, {transform_indices = @transform_2, window_bounds = array<i64: 1, 5, 8, 128>}]} {
    %c0 = arith.constant 0 : index
    %c0_0 = arith.constant 0 : index
    %c0_1 = arith.constant 0 : index
    %c0_2 = arith.constant 0 : index
    %0 = vector.load %arg1[%c0, %c0_0, %c0_1, %c0_2] : memref<2x12x8x128xf32, #tpu.memory_space<vmem>>, vector<2x12x8x128xf32>
    %c0_3 = arith.constant 0 : index
    %c0_4 = arith.constant 0 : index
    %c0_5 = arith.constant 0 : index
    %c0_6 = arith.constant 0 : index
    %1 = vector.load %arg2[%c0_3, %c0_4, %c0_5, %c0_6] : memref<2x12x8x128xf32, #tpu.memory_space<vmem>>, vector<2x12x8x128xf32>
    %2 = vector.extract_strided_slice %0 {offsets = [0, 0, 0, 0], sizes = [2, 3, 8, 128], strides = [1, 1, 1, 1]} : vector<2x12x8x128xf32> to vector<2x3x8x128xf32>
    %cst = arith.constant -1.000000e+00 : f32
    %cst_7 = arith.constant 1.000000e+00 : f32
    %3 = vector.broadcast %cst : f32 to vector<2x3x8x128xf32>
    %4 = arith.maximumf %3, %2 : vector<2x3x8x128xf32>
    %5 = vector.broadcast %cst_7 : f32 to vector<2x3x8x128xf32>
    %6 = arith.minimumf %5, %4 : vector<2x3x8x128xf32>
    %7 = vector.extract_strided_slice %0 {offsets = [0, 3, 0, 0], sizes = [2, 3, 8, 128], strides = [1, 1, 1, 1]} : vector<2x12x8x128xf32> to vector<2x3x8x128xf32>
    %cst_8 = arith.constant 0.000000e+00 : f32
    %cst_9 = arith.constant 1.000000e+00 : f32
    %8 = vector.broadcast %cst_8 : f32 to vector<2x3x8x128xf32>
    %9 = arith.maximumf %8, %7 : vector<2x3x8x128xf32>
    %10 = vector.broadcast %cst_9 : f32 to vector<2x3x8x128xf32>
    %11 = arith.minimumf %10, %9 : vector<2x3x8x128xf32>
    %cst_10 = arith.constant 9.99999974E-6 : f32
    %12 = vector.broadcast %cst_10 : f32 to vector<2x3x8x128xf32>
    %13 = arith.addf %11, %12 : vector<2x3x8x128xf32>
    %14 = math.log %13 : vector<2x3x8x128xf32>
    %15 = vector.extract_strided_slice %0 {offsets = [0, 6, 0, 0], sizes = [2, 3, 8, 128], strides = [1, 1, 1, 1]} : vector<2x12x8x128xf32> to vector<2x3x8x128xf32>
    %cst_11 = arith.constant 0.000000e+00 : f32
    %cst_12 = arith.constant 1.000000e+00 : f32
    %16 = vector.broadcast %cst_11 : f32 to vector<2x3x8x128xf32>
    %17 = arith.maximumf %16, %15 : vector<2x3x8x128xf32>
    %18 = vector.broadcast %cst_12 : f32 to vector<2x3x8x128xf32>
    %19 = arith.minimumf %18, %17 : vector<2x3x8x128xf32>
    %20 = vector.extract_strided_slice %0 {offsets = [0, 9, 0, 0], sizes = [2, 3, 8, 128], strides = [1, 1, 1, 1]} : vector<2x12x8x128xf32> to vector<2x3x8x128xf32>
    %cst_13 = arith.constant 0.000000e+00 : f32
    %cst_14 = arith.constant 1.000000e+00 : f32
    %21 = vector.broadcast %cst_13 : f32 to vector<2x3x8x128xf32>
    %22 = arith.maximumf %21, %20 : vector<2x3x8x128xf32>
    %23 = vector.broadcast %cst_14 : f32 to vector<2x3x8x128xf32>
    %24 = arith.minimumf %23, %22 : vector<2x3x8x128xf32>
    %cst_15 = arith.constant 9.99999974E-6 : f32
    %25 = vector.broadcast %cst_15 : f32 to vector<2x3x8x128xf32>
    %26 = arith.addf %24, %25 : vector<2x3x8x128xf32>
    %27 = math.log %26 : vector<2x3x8x128xf32>
    %28 = vector.extract_strided_slice %1 {offsets = [0, 0, 0, 0], sizes = [2, 3, 8, 128], strides = [1, 1, 1, 1]} : vector<2x12x8x128xf32> to vector<2x3x8x128xf32>
    %29 = vector.extract_strided_slice %1 {offsets = [0, 3, 0, 0], sizes = [2, 3, 8, 128], strides = [1, 1, 1, 1]} : vector<2x12x8x128xf32> to vector<2x3x8x128xf32>
    %cst_16 = arith.constant 9.99999974E-6 : f32
    %30 = vector.broadcast %cst_16 : f32 to vector<2x3x8x128xf32>
    %31 = arith.addf %29, %30 : vector<2x3x8x128xf32>
    %32 = math.log %31 : vector<2x3x8x128xf32>
    %33 = vector.extract_strided_slice %1 {offsets = [0, 6, 0, 0], sizes = [2, 3, 8, 128], strides = [1, 1, 1, 1]} : vector<2x12x8x128xf32> to vector<2x3x8x128xf32>
    %34 = vector.extract_strided_slice %1 {offsets = [0, 9, 0, 0], sizes = [2, 3, 8, 128], strides = [1, 1, 1, 1]} : vector<2x12x8x128xf32> to vector<2x3x8x128xf32>
    %cst_17 = arith.constant 9.99999974E-6 : f32
    %35 = vector.broadcast %cst_17 : f32 to vector<2x3x8x128xf32>
    %36 = arith.addf %34, %35 : vector<2x3x8x128xf32>
    %37 = math.log %36 : vector<2x3x8x128xf32>
    %38 = arith.subf %6, %28 : vector<2x3x8x128xf32>
    %39 = math.absf %38 : vector<2x3x8x128xf32>
    %40 = vector.shape_cast %39 : vector<2x3x8x128xf32> to vector<6x8x128xf32>
    %cst_18 = arith.constant dense<0.000000e+00> : vector<8x128xf32>
    %41 = vector.multi_reduction <add>, %40, %cst_18 [0] : vector<6x8x128xf32> to vector<8x128xf32>
    %c0_19 = arith.constant 0 : index
    %c0_20 = arith.constant 0 : index
    %c0_21 = arith.constant 0 : index
    %c0_22 = arith.constant 0 : index
    %42 = vector.load %arg3[%c0_19, %c0_20, %c0_21, %c0_22] : memref<1x5x8x128xf32, #tpu.memory_space<vmem>>, vector<1x1x8x128xf32>
    %43 = vector.shape_cast %42 : vector<1x1x8x128xf32> to vector<8x128xf32>
    %44 = vector.shape_cast %41 : vector<8x128xf32> to vector<1x1x8x128xf32>
    tpu.vector_store %arg3[%c0_19, %c0_20, %c0_21, %c0_22], %44 {strides = array<i32>} : memref<1x5x8x128xf32, #tpu.memory_space<vmem>>, vector<1x1x8x128xf32>,
    %45 = arith.subf %14, %32 : vector<2x3x8x128xf32>
    %46 = math.absf %45 : vector<2x3x8x128xf32>
    %47 = vector.shape_cast %46 : vector<2x3x8x128xf32> to vector<6x8x128xf32>
    %cst_23 = arith.constant dense<0.000000e+00> : vector<8x128xf32>
    %48 = vector.multi_reduction <add>, %47, %cst_23 [0] : vector<6x8x128xf32> to vector<8x128xf32>
    %c0_24 = arith.constant 0 : index
    %c1 = arith.constant 1 : index
    %c0_25 = arith.constant 0 : index
    %c0_26 = arith.constant 0 : index
    %49 = vector.load %arg3[%c0_24, %c1, %c0_25, %c0_26] : memref<1x5x8x128xf32, #tpu.memory_space<vmem>>, vector<1x1x8x128xf32>
    %50 = vector.shape_cast %49 : vector<1x1x8x128xf32> to vector<8x128xf32>
    %51 = vector.shape_cast %48 : vector<8x128xf32> to vector<1x1x8x128xf32>
    tpu.vector_store %arg3[%c0_24, %c1, %c0_25, %c0_26], %51 {strides = array<i32>} : memref<1x5x8x128xf32, #tpu.memory_space<vmem>>, vector<1x1x8x128xf32>,
    %52 = arith.subf %19, %33 : vector<2x3x8x128xf32>
    %53 = math.absf %52 : vector<2x3x8x128xf32>
    %54 = vector.shape_cast %53 : vector<2x3x8x128xf32> to vector<6x8x128xf32>
    %cst_27 = arith.constant dense<0.000000e+00> : vector<8x128xf32>
    %55 = vector.multi_reduction <add>, %54, %cst_27 [0] : vector<6x8x128xf32> to vector<8x128xf32>
    %c0_28 = arith.constant 0 : index
    %c2 = arith.constant 2 : index
    %c0_29 = arith.constant 0 : index
    %c0_30 = arith.constant 0 : index
    %56 = vector.load %arg3[%c0_28, %c2, %c0_29, %c0_30] : memref<1x5x8x128xf32, #tpu.memory_space<vmem>>, vector<1x1x8x128xf32>
    %57 = vector.shape_cast %56 : vector<1x1x8x128xf32> to vector<8x128xf32>
    %58 = vector.shape_cast %55 : vector<8x128xf32> to vector<1x1x8x128xf32>
    tpu.vector_store %arg3[%c0_28, %c2, %c0_29, %c0_30], %58 {strides = array<i32>} : memref<1x5x8x128xf32, #tpu.memory_space<vmem>>, vector<1x1x8x128xf32>,
    %59 = arith.subf %27, %37 : vector<2x3x8x128xf32>
    %60 = math.absf %59 : vector<2x3x8x128xf32>
    %61 = vector.shape_cast %60 : vector<2x3x8x128xf32> to vector<6x8x128xf32>
    %cst_31 = arith.constant dense<0.000000e+00> : vector<8x128xf32>
    %62 = vector.multi_reduction <add>, %61, %cst_31 [0] : vector<6x8x128xf32> to vector<8x128xf32>
    %c0_32 = arith.constant 0 : index
    %c3 = arith.constant 3 : index
    %c0_33 = arith.constant 0 : index
    %c0_34 = arith.constant 0 : index
    %63 = vector.load %arg3[%c0_32, %c3, %c0_33, %c0_34] : memref<1x5x8x128xf32, #tpu.memory_space<vmem>>, vector<1x1x8x128xf32>
    %64 = vector.shape_cast %63 : vector<1x1x8x128xf32> to vector<8x128xf32>
    %65 = vector.shape_cast %62 : vector<8x128xf32> to vector<1x1x8x128xf32>
    tpu.vector_store %arg3[%c0_32, %c3, %c0_33, %c0_34], %65 {strides = array<i32>} : memref<1x5x8x128xf32, #tpu.memory_space<vmem>>, vector<1x1x8x128xf32>,
    %66 = vector.shape_cast %1 : vector<2x12x8x128xf32> to vector<24x8x128xf32>
    %cst_35 = arith.constant dense<0.000000e+00> : vector<8x128xf32>
    %67 = vector.multi_reduction <add>, %66, %cst_35 [0] : vector<24x8x128xf32> to vector<8x128xf32>
    %c0_36 = arith.constant 0 : index
    %c4 = arith.constant 4 : index
    %c0_37 = arith.constant 0 : index
    %c0_38 = arith.constant 0 : index
    %68 = vector.load %arg3[%c0_36, %c4, %c0_37, %c0_38] : memref<1x5x8x128xf32, #tpu.memory_space<vmem>>, vector<1x1x8x128xf32>
    %69 = vector.shape_cast %68 : vector<1x1x8x128xf32> to vector<8x128xf32>
    %70 = vector.shape_cast %67 : vector<8x128xf32> to vector<1x1x8x128xf32>
    tpu.vector_store %arg3[%c0_36, %c4, %c0_37, %c0_38], %70 {strides = array<i32>} : memref<1x5x8x128xf32, #tpu.memory_space<vmem>>, vector<1x1x8x128xf32>,
    return
  }
  func.func @transform_0(%arg0: i32) -> (i32, i32, i32, i32) {
    %c0_i32 = arith.constant 0 : i32
    %c0_i32_0 = arith.constant 0 : i32
    %c0_i32_1 = arith.constant 0 : i32
    %c0_i32_2 = arith.constant 0 : i32
    return %c0_i32, %c0_i32_0, %arg0, %c0_i32_1 : i32, i32, i32, i32
  }
  func.func @transform_1(%arg0: i32) -> (i32, i32, i32, i32) {
    %c0_i32 = arith.constant 0 : i32
    %c0_i32_0 = arith.constant 0 : i32
    %c0_i32_1 = arith.constant 0 : i32
    %c0_i32_2 = arith.constant 0 : i32
    return %c0_i32, %c0_i32_0, %arg0, %c0_i32_1 : i32, i32, i32, i32
  }
  func.func @transform_2(%arg0: i32) -> (i32, i32, i32, i32) {
    %c0_i32 = arith.constant 0 : i32
    %c0_i32_0 = arith.constant 0 : i32
    %c0_i32_1 = arith.constant 0 : i32
    %c0_i32_2 = arith.constant 0 : i32
    return %arg0, %c0_i32, %c0_i32_0, %c0_i32_1 : i32, i32, i32, i32
  }
}

</mosaic_0001>

<bundles_post_ra>
// kernel: tpu_custom_call.1
= control target key start
LH: loop header
LB: loop body
LE: loop exit
PB: predicated region body
PF: predicated region fallthrough
CT: control target
= control target key end

     0   :  { %7 = vsyncpa [#allocation3], 0  ;;  %s588_s0 = inlined_call_operand.hbm [shape: f32[2,12,8,128], index: 0, kind: input, shape index: {}]   ;;  %s589_s1 = inlined_call_operand.hbm [shape: f32[2,12,8,128], index: 1, kind: input, shape index: {}]   ;;  %s590_s2 = inlined_call_operand.hbm [shape: f32[1,5,8,128], index: 2, kind: output, shape index: {}]  }
   0x1   :  { %8 = vsyncpa [#allocation6], 0 }
   0x2   :  { %9 = vsyncpa [#allocation4], 0  ;;  %s457_s9 = smov [#allocation2]   ;;  %s385_s13 = scalar_lea.hbm %s588_s0, 3072 }
   0x3   :  { %s15_s10 = sshll.u32 %s457_s9, 4  ;;  %p386_p0 = scmp.ne.s32.totalorder %s588_s0, %s385_s13  ;;  %s16_s10 = int_to_ptr.vmem [resolvable:$true] %s15_s10 }
   0x4   :  { %p389_p1 = scmp.lt.u32.totalorder %s385_s13, %s588_s0 }
   0x6   :  { %p391_p2 = pnand %p389_p1, %p386_p0 }
   0x8   :  { %394 = shalt.err (!%p391_p2)
}
   0x9   :  { %s395_s18 = scalar_lea.vmem %s16_s10, 3072  ;;  %p400_p4 = scmp.lt.s32.totalorder %s16_s10, %s16_s10 }
   0xa   :  { %p396_p3 = scmp.ne.s32.totalorder %s16_s10, %s395_s18  ;;  %p401_p5 = scmp.lt.s32.totalorder %s395_s18, %s395_s18 }
   0xc   :  { %p402_p6 = por %p401_p5, %p400_p4 }
   0xe   :  { %p403_p7 = pnand %p402_p6, %p396_p3 }
  0x10   :  { %406 = shalt.err (!%p403_p7)
}
  0x11   :  { %s458_s19 = smov 128   ;;  %s459_s20 = smov 8  }
  0x12   :  { %21 = dma.hbm_to_vmem [thread:$0]  %s588_s0, 3072, %s16_s10, [#allocation3], %s458_s19, %s458_s19, %s459_s20  }
  0x13   :  { %s460_s23 = smov [#allocation5]   ;;  %s407_s27 = scalar_lea.hbm %s589_s1, 3072 }
  0x14   :  { %s27_s24 = sshll.u32 %s460_s23, 4  ;;  %p408_p8 = scmp.ne.s32.totalorder %s589_s1, %s407_s27  ;;  %s28_s24 = int_to_ptr.vmem [resolvable:$true] %s27_s24 }
  0x15   :  { %p411_p9 = scmp.lt.u32.totalorder %s407_s27, %s589_s1 }
  0x17   :  { %p413_p10 = pnand %p411_p9, %p408_p8 }
  0x19   :  { %416 = shalt.err (!%p413_p10)
}
  0x1a   :  { %s417_s4 = scalar_lea.vmem %s28_s24, 3072  ;;  %p422_p12 = scmp.lt.s32.totalorder %s28_s24, %s28_s24 }
  0x1b   :  { %p418_p11 = scmp.ne.s32.totalorder %s28_s24, %s417_s4  ;;  %p423_p13 = scmp.lt.s32.totalorder %s417_s4, %s417_s4 }
  0x1d   :  { %p424_p0 = por %p423_p13, %p422_p12 }
  0x1f   :  { %p425_p1 = pnand %p424_p0, %p418_p11 }
  0x21   :  { %428 = shalt.err (!%p425_p1)
}
  0x22   :  { %33 = dma.hbm_to_vmem [thread:$0]  %s589_s1, 3072, %s28_s24, [#allocation6], %s458_s19, %s458_s19, %s459_s20  }
  0x23   :  { %451 = dma.done.wait [#allocation3], 3072  }
  0x24   :  { %452 = vsyncadd [#allocation3], 4294964224 }
  0x25   :  { %453 = dma.done.wait [#allocation6], 3072  }
  0x26   :  { %454 = vsyncadd [#allocation6], 4294964224  ;;  %v40_v0 = vld [vmem:[#allocation2] sm:$0xff]  ;;  %v41_v1 = vld [vmem:[#allocation2 + $0x8] sm:$0xff]  ;;  %s461_s1 = smov [#allocation7]  }
  0x27   :  { %v42_v2 = vld [vmem:[#allocation2 + $0x10] sm:$0xff]  ;;  %v52_v3 = vld [vmem:[#allocation2 + $0x60] sm:$0xff]  ;;  %v53_v4 = vld [vmem:[#allocation2 + $0x68] sm:$0xff]  ;;  %v326_v6 = vclamps-f32 %v40_v0, 1.0  ;;  %v327_v7 = vclamps-f32 %v41_v1, 1.0  ;;  %s313_s6 = sshll.u32 %s461_s1, 4  ;;  %s314_s6 = int_to_ptr.vmem [resolvable:$true] %s313_s6 }
  0x28   :  { %v54_v5 = vld [vmem:[#allocation2 + $0x70] sm:$0xff]  ;;  %v328_v8 = vclamps-f32 %v42_v2, 1.0  ;;  %v64_v9 = vld [vmem:[#allocation5] sm:$0xff]  ;;  %v65_v10 = vld [vmem:[#allocation5 + $0x8] sm:$0xff]  ;;  %v329_v11 = vclamps-f32 %v52_v3, 1.0  ;;  %v330_v14 = vclamps-f32 %v53_v4, 1.0  ;;  %p434_p3 = scmp.lt.s32.totalorder %s314_s6, %s314_s6 }
  0x29   :  { %v66_v12 = vld [vmem:[#allocation5 + $0x10] sm:$0xff]  ;;  %v67_v13 = vld [vmem:[#allocation5 + $0x18] sm:$0xff]  ;;  %v331_v15 = vclamps-f32 %v54_v5, 1.0  ;;  %v208_v16 = vsub.f32 %v326_v6, %v64_v9  ;;  %v283_v17 = vadd.f32 %v65_v10, %v64_v9  ;;  %v209_v19 = vsub.f32 %v327_v7, %v65_v10  ;;  %v511_v23 = vld [vmem:[#allocation5 + $0x60] sm:$0xff]  ;;  %s429_s7 = scalar_lea.vmem %s314_s6, 640 }
  0x2a   :  { %v172_v18 = vadd.f32 1e-05, %v67_v13  ;;  %v210_v20 = vsub.f32 %v328_v8, %v66_v12  ;;  %v507_v21 = vld [vmem:[#allocation5 + $0x50] sm:$0xff]  ;;  %v509_v22 = vld [vmem:[#allocation5 + $0x58] sm:$0xff]  ;;  %v513_v24 = vld [vmem:[#allocation5 + $0x68] sm:$0xff]  ;;  %v211_v31 = vsub.f32 %v329_v11, %v511_v23  ;;  %p430_p2 = scmp.ne.s32.totalorder %s314_s6, %s429_s7  ;;  %p435_p4 = scmp.lt.s32.totalorder %s429_s7, %s429_s7 }
  0x2b   :  { %v515_v25 = vld [vmem:[#allocation5 + $0x70] sm:$0xff]  ;;  %v214_v26 = vand.u32 2147483647, %v208_v16  ;;  %v284_v27 = vadd.f32 %v283_v17, %v66_v12  ;;  %v68_v28 = vld [vmem:[#allocation5 + $0x20] sm:$0xff]  ;;  %v517_v29 = vld [vmem:[#allocation5 + $0x78] sm:$0xff]  ;;  %v212_v32 = vsub.f32 %v330_v14, %v513_v24 }
  0x2c   :  { %v191_v30 = vadd.f32 1e-05, %v507_v21  ;;  %v213_v33 = vsub.f32 %v331_v15, %v515_v25  ;;  %v43_v34 = vld [vmem:[#allocation2 + $0x18] sm:$0xff]  ;;  %337 = vlog2.f32 %v172_v18  ;;  %v192_v35 = vadd.f32 1e-05, %v509_v22  ;;  %v44_v44 = vld [vmem:[#allocation2 + $0x20] sm:$0xff]  ;;  %p436_p5 = por %p435_p4, %p434_p3 }
  0x2d   :  { %v215_v36 = vand.u32 2147483647, %v209_v19  ;;  %v216_v37 = vand.u32 2147483647, %v210_v20  ;;  %v175_v38 = vadd.f32 1e-05, %v517_v29  ;;  %v285_v43 = vadd.f32 %v284_v27, %v67_v13 }
  0x2e   :  { %v217_v39 = vand.u32 2147483647, %v211_v31  ;;  %v218_v40 = vand.u32 2147483647, %v212_v32  ;;  %v219_v41 = vand.u32 2147483647, %v213_v33  ;;  %339 = vlog2.f32 %v191_v30  ;;  %p437_p6 = pnand %p436_p5, %p430_p2 }
  0x2f   :  { %v220_v42 = vadd.f32 %v215_v36, %v214_v26  ;;  %v45_v45 = vld [vmem:[#allocation2 + $0x28] sm:$0xff]  ;;  %v55_v46 = vld [vmem:[#allocation2 + $0x78] sm:$0xff]  ;;  %v100_v47 = vmax.f32 %v43_v34, 0.0  ;;  %v56_v49 = vld [vmem:[#allocation2 + $0x80] sm:$0xff]  ;;  %v101_v51 = vmax.f32 %v44_v44, 0.0  ;;  %v286_v55 = vadd.f32 %v285_v43, %v68_v28 }
  0x30   :  { %v69_v48 = vld [vmem:[#allocation5 + $0x28] sm:$0xff]  ;;  %v102_v52 = vmax.f32 %v45_v45, 0.0  ;;  %v103_v53 = vmax.f32 %v55_v46, 0.0  ;;  %v104_v56 = vmax.f32 %v56_v49, 0.0  ;;  %v525_v58 = vld [vmem:[#allocation5 + $0x30] sm:$0xff]  ;;  %v527_v63 = vld [vmem:[#allocation5 + $0x38] sm:$0xff]  ;;  %341 = vlog2.f32 %v175_v38 }
  0x31   :  { %v57_v50 = vld [vmem:[#allocation2 + $0x88] sm:$0xff]  ;;  %v221_v54 = vadd.f32 %v220_v42, %v216_v37  ;;  %v106_v59 = vmin.f32 %v100_v47, 1.0  ;;  %v107_v60 = vmin.f32 %v101_v51, 1.0  ;;  %v529_v0 = vld [vmem:[#allocation5 + $0x80] sm:$0xff]  ;;  %v287_v2 = vadd.f32 %v286_v55, %v69_v48  ;;  %v46_v13 = vld [vmem:[#allocation2 + $0x30] sm:$0xff] }
  0x32   :  { %v105_v57 = vmax.f32 %v57_v50, 0.0  ;;  %v108_v61 = vmin.f32 %v102_v52, 1.0  ;;  %v109_v62 = vmin.f32 %v103_v53, 1.0  ;;  %v531_v3 = vld [vmem:[#allocation5 + $0x88] sm:$0xff]  ;;  %v110_v4 = vmin.f32 %v104_v56, 1.0  ;;  %v533_v6 = vld [vmem:[#allocation5 + $0x40] sm:$0xff] }
  0x33   :  { %v222_v1 = vadd.f32 %v221_v54, %v217_v39  ;;  %v112_v7 = vadd.f32 1e-05, %v106_v59  ;;  %v113_v8 = vadd.f32 1e-05, %v107_v60  ;;  %343 = vlog2.f32 %v192_v35  ;;  %v47_v14 = vld [vmem:[#allocation2 + $0x38] sm:$0xff]  ;;  %v48_v15 = vld [vmem:[#allocation2 + $0x40] sm:$0xff] }
  0x34   :  { %v111_v5 = vmin.f32 %v105_v57, 1.0  ;;  %v114_v9 = vadd.f32 1e-05, %v108_v61  ;;  %v288_v11 = vadd.f32 %v287_v2, %v525_v58  ;;  %v115_v12 = vadd.f32 1e-05, %v109_v62  ;;  %v536_v20 = vld [vmem:[#allocation5 + $0x48] sm:$0xff] }
  0x35   :  { %v223_v10 = vadd.f32 %v222_v1, %v218_v40  ;;  %v116_v16 = vadd.f32 1e-05, %v110_v4  ;;  %345 = vlog2.f32 %v112_v7  ;;  %v173_v18 = vadd.f32 1e-05, %v68_v28  ;;  %v58_v31 = vld [vmem:[#allocation2 + $0x90] sm:$0xff]  ;;  %v59_v32 = vld [vmem:[#allocation2 + $0x98] sm:$0xff] }
  0x36   :  { %v117_v17 = vadd.f32 1e-05, %v111_v5  ;;  %v338_v19 = vpop.eup %337  ;;  %v289_v27 = vadd.f32 %v288_v11, %v527_v63  ;;  %347 = vlog2.f32 %v113_v8  ;;  %v174_v30 = vadd.f32 1e-05, %v69_v48  ;;  %v60_v35 = vld [vmem:[#allocation2 + $0xa0] sm:$0xff]  ;;  %v546_v53 = vld [vmem:[#allocation5 + $0x90] sm:$0xff] }
  0x37   :  { %v224_v26 = vadd.f32 %v223_v10, %v219_v41  ;;  %349 = vlog2.f32 %v114_v9  ;;  %v176_v33 = vadd.f32 1e-05, %v529_v0  ;;  %v177_v34 = vadd.f32 1e-05, %v531_v3  ;;  %v548_v54 = vld [vmem:[#allocation5 + $0x98] sm:$0xff]  ;;  %v550_v55 = vld [vmem:[#allocation5 + $0xa0] sm:$0xff] }
  0x38   :  { %v130_v36 = vmax.f32 %v46_v13, 0.0  ;;  %v290_v28 = vadd.f32 %v289_v27, %v533_v6  ;;  %351 = vlog2.f32 %v115_v12  ;;  %v131_v37 = vmax.f32 %v47_v14, 0.0  ;;  %v542_v39 = vpop.eup %339  ;;  %v49_v1 = vld [vmem:[#allocation2 + $0x48] sm:$0xff]  ;;  %v50_v2 = vld [vmem:[#allocation2 + $0x50] sm:$0xff]  ;;  %v51_v4 = vld [vmem:[#allocation2 + $0x58] sm:$0xff] }
  0x39   :  { %225 = vst [vmem:[#allocation7] sm:$0xff] %v224_v26  ;;  %v132_v38 = vmax.f32 %v48_v15, 0.0  ;;  %353 = vlog2.f32 %v116_v16  ;;  %v179_v40 = vmul.f32 0.6931472, %v338_v19  ;;  %v133_v41 = vmax.f32 %v58_v31, 0.0  ;;  %v61_v9 = vld [vmem:[#allocation2 + $0xa8] sm:$0xff] }
  0x3a   :  { %v134_v42 = vmax.f32 %v59_v32, 0.0  ;;  %v291_v43 = vadd.f32 %v290_v28, %v536_v20  ;;  %355 = vlog2.f32 %v117_v17  ;;  %v135_v44 = vmax.f32 %v60_v35, 0.0  ;;  %v342_v52 = vpop.eup %341  ;;  %v63_v35 = vld [vmem:[#allocation2 + $0xb8] sm:$0xff] }
  0x3b   :  { %v136_v45 = vmin.f32 %v130_v36, 1.0  ;;  %357 = vlog2.f32 %v173_v18  ;;  %v137_v46 = vmin.f32 %v131_v37, 1.0  ;;  %v138_v47 = vmin.f32 %v132_v38, 1.0 }
  0x3c   :  { %v139_v48 = vmin.f32 %v133_v41, 1.0  ;;  %v292_v49 = vadd.f32 %v291_v43, %v507_v21  ;;  %359 = vlog2.f32 %v174_v30  ;;  %v140_v50 = vmin.f32 %v134_v42, 1.0  ;;  %v62_v30 = vld [vmem:[#allocation2 + $0xb0] sm:$0xff] }
  0x3d   :  { %v141_v51 = vmin.f32 %v135_v44, 1.0  ;;  %361 = vlog2.f32 %v176_v33  ;;  %v245_v56 = vsub.f32 %v136_v45, %v525_v58  ;;  %v246_v57 = vsub.f32 %v137_v46, %v527_v63  ;;  %v555_v60 = vpop.eup %343 }
  0x3e   :  { %v247_v59 = vsub.f32 %v138_v47, %v533_v6  ;;  %v293_v21 = vadd.f32 %v292_v49, %v509_v22  ;;  %363 = vlog2.f32 %v177_v34  ;;  %v248_v61 = vsub.f32 %v139_v48, %v546_v53 }
  0x3f   :  { %v249_v62 = vsub.f32 %v140_v50, %v548_v54  ;;  %v346_v5 = vpop.eup %345  ;;  %v250_v7 = vsub.f32 %v141_v51, %v550_v55  ;;  %v251_v58 = vand.u32 2147483647, %v245_v56  ;;  %v252_v8 = vand.u32 2147483647, %v246_v57 }
  0x40   :  { %v253_v63 = vand.u32 2147483647, %v247_v59  ;;  %v348_v6 = vpop.eup %347  ;;  %v294_v10 = vadd.f32 %v293_v21, %v511_v23  ;;  %v119_v11 = vmul.f32 0.6931472, %v346_v5  ;;  %v185_v22 = vmul.f32 0.6931472, %v342_v52 }
  0x41   :  { %v254_v12 = vand.u32 2147483647, %v248_v61  ;;  %v350_v13 = vpop.eup %349  ;;  %v121_v14 = vmul.f32 0.6931472, %v348_v6  ;;  %v255_v15 = vand.u32 2147483647, %v249_v62  ;;  %v257_v17 = vadd.f32 %v252_v8, %v251_v58 }
  0x42   :  { %v256_v16 = vand.u32 2147483647, %v250_v7  ;;  %v352_v18 = vpop.eup %351  ;;  %v295_v19 = vadd.f32 %v294_v10, %v513_v24  ;;  %v123_v26 = vmul.f32 0.6931472, %v350_v13  ;;  %v226_v27 = vsub.f32 %v119_v11, %v179_v40  ;;  %v85_v13 = vld [vmem:[#allocation5 + $0xa8] sm:$0xff] }
  0x43   :  { %v142_v31 = vmax.f32 %v49_v1, 0.0  ;;  %v354_v32 = vpop.eup %353  ;;  %v125_v33 = vmul.f32 0.6931472, %v352_v18  ;;  %v258_v34 = vadd.f32 %v257_v17, %v253_v63  ;;  %v143_v23 = vmax.f32 %v50_v2, 0.0 }
  0x44   :  { %v144_v36 = vmax.f32 %v51_v4, 0.0  ;;  %v356_v28 = vpop.eup %355  ;;  %v296_v37 = vadd.f32 %v295_v19, %v515_v25  ;;  %v127_v38 = vmul.f32 0.6931472, %v354_v32  ;;  %v232_v41 = vand.u32 2147483647, %v226_v27 }
  0x45   :  { %v145_v42 = vmax.f32 %v61_v9, 0.0  ;;  %v358_v43 = vpop.eup %357  ;;  %v129_v44 = vmul.f32 0.6931472, %v356_v28  ;;  %v229_v45 = vsub.f32 %v125_v33, %v185_v22  ;;  %v259_v24 = vadd.f32 %v258_v34, %v254_v12 }
  0x46   :  { %v146_v46 = vmax.f32 %v62_v30, 0.0  ;;  %v360_v40 = vpop.eup %359  ;;  %v297_v47 = vadd.f32 %v296_v37, %v517_v29  ;;  %v181_v48 = vmul.f32 0.6931472, %v358_v43  ;;  %v147_v49 = vmax.f32 %v63_v35, 0.0  ;;  %v87_v30 = vld [vmem:[#allocation5 + $0xb8] sm:$0xff] }
  0x47   :  { %v148_v50 = vmin.f32 %v142_v31, 1.0  ;;  %v362_v51 = vpop.eup %361  ;;  %v183_v52 = vmul.f32 0.6931472, %v360_v40  ;;  %v260_v56 = vadd.f32 %v259_v24, %v255_v15  ;;  %v149_v57 = vmin.f32 %v143_v23, 1.0 }
  0x48   :  { %v150_v59 = vmin.f32 %v144_v36, 1.0  ;;  %v364_v25 = vpop.eup %363  ;;  %v298_v21 = vadd.f32 %v297_v47, %v529_v0  ;;  %v187_v61 = vmul.f32 0.6931472, %v362_v51  ;;  %v227_v62 = vsub.f32 %v121_v14, %v181_v48 }
  0x49   :  { %v151_v1 = vmin.f32 %v145_v42, 1.0  ;;  %v189_v2 = vmul.f32 0.6931472, %v364_v25  ;;  %v228_v4 = vsub.f32 %v123_v26, %v183_v52  ;;  %v261_v5 = vadd.f32 %v260_v56, %v256_v16 }
  0x4a   :  { %v152_v7 = vmin.f32 %v146_v46, 1.0  ;;  %v230_v58 = vsub.f32 %v127_v38, %v187_v61  ;;  %v233_v29 = vand.u32 2147483647, %v227_v62  ;;  %v299_v8 = vadd.f32 %v298_v21, %v531_v3  ;;  %v86_v3 = vld [vmem:[#allocation5 + $0xb0] sm:$0xff] }
  0x4b   :  { %v153_v63 = vmin.f32 %v147_v49, 1.0  ;;  %v231_v9 = vsub.f32 %v129_v44, %v189_v2  ;;  %v234_v6 = vand.u32 2147483647, %v228_v4  ;;  %263 = vst [vmem:[#allocation7 + $0x10] sm:$0xff] %v261_v5  ;;  %v154_v10 = vadd.f32 1e-05, %v148_v50 }
  0x4c   :  { %v155_v11 = vadd.f32 1e-05, %v149_v57  ;;  %v235_v22 = vand.u32 2147483647, %v229_v45  ;;  %v238_v12 = vadd.f32 %v233_v29, %v232_v41  ;;  %v300_v0 = vadd.f32 %v299_v8, %v546_v53 }
  0x4d   :  { %v156_v14 = vadd.f32 1e-05, %v150_v59  ;;  %v236_v15 = vand.u32 2147483647, %v230_v58  ;;  %v157_v17 = vadd.f32 1e-05, %v151_v1  ;;  %365 = vlog2.f32 %v154_v10 }
  0x4e   :  { %v158_v16 = vadd.f32 1e-05, %v152_v7  ;;  %v239_v18 = vadd.f32 %v238_v12, %v234_v6  ;;  %v301_v19 = vadd.f32 %v300_v0, %v548_v54  ;;  %v159_v26 = vadd.f32 1e-05, %v153_v63 }
  0x4f   :  { %367 = vlog2.f32 %v155_v11  ;;  %v237_v27 = vand.u32 2147483647, %v231_v9  ;;  %v190_v31 = vadd.f32 1e-05, %v536_v20  ;;  %v193_v33 = vadd.f32 1e-05, %v85_v13 }
  0x50   :  { %369 = vlog2.f32 %v156_v14  ;;  %v240_v32 = vadd.f32 %v239_v18, %v235_v22  ;;  %v302_v53 = vadd.f32 %v301_v19, %v550_v55  ;;  %v194_v34 = vadd.f32 1e-05, %v86_v3 }
  0x51   :  { %371 = vlog2.f32 %v157_v17  ;;  %v195_v23 = vadd.f32 1e-05, %v87_v30  ;;  %v199_v55 = vmul.f32 0.6931472, %v542_v39  ;;  %v201_v45 = vmul.f32 0.6931472, %v555_v60 }
  0x52   :  { %373 = vlog2.f32 %v158_v16  ;;  %v241_v35 = vadd.f32 %v240_v32, %v236_v15  ;;  %v303_v36 = vadd.f32 %v302_v53, %v85_v13 }
  0x53   :  { %375 = vlog2.f32 %v159_v26 }
  0x54   :  { %377 = vlog2.f32 %v190_v31  ;;  %v242_v54 = vadd.f32 %v241_v35, %v237_v27  ;;  %v304_v28 = vadd.f32 %v303_v36, %v86_v3 }
  0x55   :  { %379 = vlog2.f32 %v193_v33 }
  0x56   :  { %381 = vlog2.f32 %v194_v34  ;;  %244 = vst [vmem:[#allocation7 + $0x8] sm:$0xff] %v242_v54  ;;  %v305_v37 = vadd.f32 %v304_v28, %v87_v30 }
  0x57   :  { %383 = vlog2.f32 %v195_v23  ;;  %v366_v20 = vpop.eup %365 }
  0x58   :  { %307 = vst [vmem:[#allocation7 + $0x20] sm:$0xff] %v305_v37  ;;  %v161_v40 = vmul.f32 0.6931472, %v366_v20 }
  0x59   :  { %v368_v38 = vpop.eup %367 }
  0x5a   :  { %v370_v41 = vpop.eup %369  ;;  %v163_v42 = vmul.f32 0.6931472, %v368_v38 }
  0x5b   :  { %v372_v43 = vpop.eup %371  ;;  %v165_v44 = vmul.f32 0.6931472, %v370_v41 }
  0x5c   :  { %v374_v24 = vpop.eup %373  ;;  %v265_v47 = vsub.f32 %v163_v42, %v199_v55  ;;  %v167_v49 = vmul.f32 0.6931472, %v372_v43 }
  0x5d   :  { %v376_v46 = vpop.eup %375  ;;  %v169_v51 = vmul.f32 0.6931472, %v374_v24  ;;  %v266_v56 = vsub.f32 %v165_v44, %v201_v45 }
  0x5e   :  { %v378_v48 = vpop.eup %377  ;;  %v171_v25 = vmul.f32 0.6931472, %v376_v46  ;;  %v271_v62 = vand.u32 2147483647, %v265_v47 }
  0x5f   :  { %v380_v50 = vpop.eup %379  ;;  %v197_v52 = vmul.f32 0.6931472, %v378_v48  ;;  %v272_v5 = vand.u32 2147483647, %v266_v56 }
  0x60   :  { %v382_v57 = vpop.eup %381  ;;  %v203_v59 = vmul.f32 0.6931472, %v380_v50 }
  0x61   :  { %v384_v39 = vpop.eup %383  ;;  %v205_v21 = vmul.f32 0.6931472, %v382_v57  ;;  %v264_v61 = vsub.f32 %v161_v40, %v197_v52 }
  0x62   :  { %v207_v1 = vmul.f32 0.6931472, %v384_v39  ;;  %v267_v2 = vsub.f32 %v167_v49, %v203_v59 }
  0x63   :  { %v268_v60 = vsub.f32 %v169_v51, %v205_v21  ;;  %v270_v4 = vand.u32 2147483647, %v264_v61 }
  0x64   :  { %v269_v7 = vsub.f32 %v171_v25, %v207_v1  ;;  %v273_v58 = vand.u32 2147483647, %v267_v2 }
  0x65   :  { %v276_v29 = vadd.f32 %v271_v62, %v270_v4  ;;  %v274_v8 = vand.u32 2147483647, %v268_v60 }
  0x66   :  { %v275_v9 = vand.u32 2147483647, %v269_v7 }
  0x67   :  { %v277_v63 = vadd.f32 %v276_v29, %v272_v5 }
  0x69   :  { %v278_v6 = vadd.f32 %v277_v63, %v273_v58 }
  0x6b   :  { %v279_v10 = vadd.f32 %v278_v6, %v274_v8 }
  0x6d   :  { %v280_v11 = vadd.f32 %v279_v10, %v275_v9 }
  0x6f   :  { %282 = vst [vmem:[#allocation7 + $0x18] sm:$0xff] %v280_v11 }
  0x70   :  { %440 = shalt.err (!%p437_p6)
}
  0x71   :  { %s441_s10 = scalar_lea.hbm %s590_s2, 640 }
  0x72   :  { %p442_p7 = scmp.ne.s32.totalorder %s590_s2, %s441_s10  ;;  %p445_p8 = scmp.lt.u32.totalorder %s441_s10, %s590_s2 }
  0x74   :  { %p447_p9 = pnand %p445_p8, %p442_p7 }
  0x76   :  { %450 = shalt.err (!%p447_p9)
}
  0x77   :  { %319 = dma.vmem_to_hbm [thread:$0]  %s314_s6, 640, %s590_s2, [#allocation4], %s458_s19, %s458_s19, %s459_s20  }
  0x78   :  { %455 = dma.done.wait [#allocation4], 640  }
  0x79   :  { %456 = vsyncadd [#allocation4], 4294966656 }
  0x7a   :  { %323 = vsyncpa [#allocation3], 1 }
  0x7b   :  { %324 = vsyncpa [#allocation6], 1 }
  0x7c   :  { %325 = vsyncpa [#allocation4], 1 }

</bundles_post_ra>
